<compile_context>
chip_gen: v6e
topology: v6e:2x2x1
jax: 0.10.0
libtpu: 0.0.40
codegen_flags: <defaults>
</compile_context>

<pallas_src>
import jax
import jax.numpy as jnp
from jax.experimental import pallas as pl
from jax.experimental.pallas import tpu as pltpu


def _down2x2_kernel(xb_ref, xh_ref, w_ref, o_ref):
    """Fused Conv2d(C, C//2, 3, pad=1) + PixelUnshuffle(2) on one (batch, row tile).

    xb_ref: (1, TH2, W2+1, 4*Cin)  space-to-depth prep rows [t*TH2, (t+1)*TH2)
    xh_ref: (1, 1,   W2+1, 4*Cin)  prep row (t+1)*TH2  (1-row halo)
    w_ref : (4, 4*Cin, 4*Cout)     folded weights (constant index_map -> resident)
    o_ref : (1, 4*Cout, TH2*W2)    NCHW output, W-flattened (lane-dense)
    """
    TH2 = xb_ref.shape[1]
    Wp2 = xb_ref.shape[2]
    Cin4 = xb_ref.shape[3]
    Cout4 = o_ref.shape[1]
    W2 = Wp2 - 1

    # Row tile plus its 1-row halo: (TH2+1, W2+1, 4*Cin).
    x = jnp.concatenate([xb_ref[0], xh_ref[0]], axis=0)

    # 2x2 VALID conv as 4 accumulated MXU matmuls with K = 4*Cin.
    # (No im2col patch scratch: the packing was lane-masked VMEM traffic and
    # the op is HBM-bound, so MXU occupancy from a deeper K is free anyway.)
    acc = None
    for ri in range(2):
        for si in range(2):
            xs = x[ri:ri + TH2, si:si + W2, :].reshape(TH2 * W2, Cin4)
            part = jnp.dot(xs, w_ref[2 * ri + si],
                           preferred_element_type=jnp.float32)
            acc = part if acc is None else acc + part

    # Emit NCHW directly: one in-VMEM transpose (XLU) instead of an extra
    # output-sized HBM transpose pass in the wrapper.
    o_ref[...] = acc.T.reshape(1, Cout4, TH2 * W2).astype(o_ref.dtype)


def _vmem_capacity_bytes():
    # Generation-aware: 128 MiB (v5e/v6e) vs 64 MiB (v7x).  Conservative
    # fallback to the smallest figure if the query is unavailable.
    try:
        cap = int(pltpu.get_tpu_info().vmem_capacity_bytes)
        if cap > 0:
            return cap
    except Exception:
        pass
    return 64 * 1024 * 1024


def _choose_row_tile(H2, W2, Cin4, Cout4, in_isz, out_isz, budget, *, min_tiles=1):
    """Largest TH2 (divisor of H2) whose working set fits `budget`.

    TH2*W2 must be a multiple of 128 (unmasked lane-dense stores) unless the
    tile is the whole image.  min_tiles=2 prefers >=2 grid steps so both v7x
    TensorCores get work even when B == 1.
    """
    def need(TH2):
        body = TH2 * (W2 + 1) * Cin4 * in_isz          # input row tile
        halo = (W2 + 1) * Cin4 * in_isz                # 1-row halo
        outb = Cout4 * TH2 * W2 * out_isz              # output tile
        wgt = 4 * Cin4 * Cout4 * in_isz                # resident folded weights
        work = (TH2 + 1) * (W2 + 1) * Cin4 * in_isz    # concat copy
        work += TH2 * W2 * Cin4 * in_isz               # one live tap slice
        work += 3 * TH2 * W2 * Cout4 * 4               # f32 acc + transpose temps
        return 2 * (body + halo + outb) + wgt + work   # 2x: double-buffered pipeline

    cands = [d for d in range(H2, 0, -1)
             if H2 % d == 0 and (d == H2 or (d * W2) % 128 == 0)]
    if min_tiles > 1:
        split = [d for d in cands if H2 // d >= min_tiles]
        if split:
            cands = split
    for d in cands:
        if need(d) <= budget:
            return d, need(d)
    d = cands[-1]
    return d, need(d)


def _fused_conv_unshuffle(prep, w_fold, *, out_dtype, H2, W2, TH2,
                          vmem_limit_bytes, cost):
    """prep: (B, H2+1, W2+1, 4*Cin), w_fold: (4, 4*Cin, 4*Cout) -> (B, 4*Cout, H2*W2)."""
    B, _, Wp2, Cin4 = prep.shape
    Cout4 = w_fold.shape[-1]
    nt = H2 // TH2
    return pl.pallas_call(
        _down2x2_kernel,
        out_shape=jax.ShapeDtypeStruct((B, Cout4, H2 * W2), out_dtype),
        grid_spec=pltpu.PrefetchScalarGridSpec(
            num_scalar_prefetch=0,
            grid=(B, nt),
            in_specs=[
                # body rows of the prep array
                pl.BlockSpec((1, TH2, Wp2, Cin4), lambda b, t: (b, t, 0, 0)),
                # 1-row halo: same array passed a second time, block height 1
                pl.BlockSpec((1, 1, Wp2, Cin4),
                             lambda b, t: (b, (t + 1) * TH2, 0, 0)),
                # folded weights, constant index_map -> VMEM resident
                pl.BlockSpec((4, Cin4, Cout4), lambda b, t: (0, 0, 0)),
            ],
            out_specs=pl.BlockSpec((1, Cout4, TH2 * W2), lambda b, t: (b, 0, t)),
        ),
        compiler_params=pltpu.CompilerParams(
            dimension_semantics=("parallel", "parallel"),
            vmem_limit_bytes=vmem_limit_bytes,
        ),
        cost_estimate=cost,
    )(prep, prep, w_fold)


def downsample_forward(x_nchw, w_oihw, *, mxu_dtype=jnp.bfloat16):
    """DownSample forward: Conv2d(C, C//2, 3, pad=1, bias=False) + PixelUnshuffle(2).

    x_nchw : (B, C, H, W)
    w_oihw : (C//2, C, 3, 3)   (PyTorch conv weight layout)
    returns: (B, 2*C, H//2, W//2)
    """
    B, C, H, W = x_nchw.shape
    Cout = w_oihw.shape[0]
    assert w_oihw.shape == (Cout, C, 3, 3)
    assert H % 2 == 0 and W % 2 == 0
    H2, W2 = H // 2, W // 2
    Cin4, Cout4 = 4 * C, 4 * Cout
    out_dtype = x_nchw.dtype

    # MXU feed dtype: bf16 + f32 accumulation for f32 inputs (single-pass MXU,
    # halves the HBM-bound prep traffic); low-precision inputs pass through.
    if x_nchw.dtype == jnp.float32 and mxu_dtype is not None:
        compute_dtype = jnp.dtype(mxu_dtype)
    else:
        compute_dtype = x_nchw.dtype

    # ---- Fold PixelUnshuffle(2) into the weights -------------------------
    # out[b, co*4+di*2+dj, h2, w2] = sum_{r,s,ci} x_pad[b, ci, 2h2+r, 2w2+s]
    #                                  * w[co, ci, r-di, s-dj]   (zero outside)
    # With r = 2*ri+ii, s = 2*si+jj this is a 2x2 VALID conv over the
    # space-to-depth(2) prep of x_pad, tap matrices w_fold[ri*2+si].
    w44 = jnp.zeros((Cout, 2, 2, C, 4, 4), w_oihw.dtype)
    for di in range(2):
        for dj in range(2):
            w44 = w44.at[:, di, dj, :, di:di + 3, dj:dj + 3].set(w_oihw)
    w44 = w44.reshape(Cout, 2, 2, C, 2, 2, 2, 2)            # [co,di,dj,ci,ri,ii,si,jj]
    w_fold = jnp.transpose(w44, (4, 6, 5, 7, 3, 0, 1, 2))   # [ri,si,ii,jj,ci,co,di,dj]
    w_fold = w_fold.reshape(4, Cin4, Cout4).astype(compute_dtype)

    # ---- Input prep: pad + space-to-depth(2) (one fused XLA pass) ---------
    # prep[b, hp2, wp2, (ii*2+jj)*C + ci] = x_pad[b, ci, 2*hp2+ii, 2*wp2+jj]
    # TODO(synk): fuse this remaining input-side HBM pass into the kernel via
    # per-channel manual DMA (pl.ANY input + make_async_copy).
    x_pad = jnp.pad(x_nchw, ((0, 0), (0, 0), (1, 1), (1, 1)))
    prep = x_pad.reshape(B, C, H2 + 1, 2, W2 + 1, 2)
    prep = jnp.transpose(prep, (0, 2, 4, 3, 5, 1)).reshape(B, H2 + 1, W2 + 1, Cin4)
    prep = prep.astype(compute_dtype)

    # ---- Row-tile + VMEM budgeting (generation aware) ---------------------
    in_isz = jnp.dtype(compute_dtype).itemsize
    out_isz = jnp.dtype(out_dtype).itemsize
    budget = int(_vmem_capacity_bytes() * 0.85)            # ~15% headroom
    TH2, need = _choose_row_tile(H2, W2, Cin4, Cout4, in_isz, out_isz, budget,
                                 min_tiles=2 if B == 1 else 1)
    vmem_limit = int(min(budget, max(2 * need, 16 * 1024 * 1024)))

    cost = pl.CostEstimate(
        flops=2 * B * H2 * W2 * (4 * Cin4) * Cout4,
        transcendentals=0,
        bytes_accessed=(prep.size * in_isz + w_fold.size * in_isz
                        + B * Cout4 * H2 * W2 * out_isz),
    )

    out_flat = _fused_conv_unshuffle(
        prep, w_fold, out_dtype=out_dtype, H2=H2, W2=W2, TH2=TH2,
        vmem_limit_bytes=vmem_limit, cost=cost)
    # Free reshape (bitcast): (B, 2C, H2*W2) -> (B, 2C, H2, W2); already NCHW.
    return out_flat.reshape(B, Cout4, H2, W2)


if __name__ == "__main__":
    key = jax.random.PRNGKey(0)
    k_x, k_w = jax.random.split(key)

    B, C, H, W = 2, 4, 16, 16
    x = jax.random.normal(k_x, (B, C, H, W), dtype=jnp.float32)
    # Conv2d(channels, channels//2, 3, bias=False) weight: (C//2, C, 3, 3)
    w = jax.random.normal(k_w, (C // 2, C, 3, 3), dtype=jnp.float32) * 0.1

    fwd = jax.jit(downsample_forward)
    out = jax.block_until_ready(fwd(x, w))

    # Reference: the kernel feeds the MXU bf16 activations/weights with f32
    # accumulation, so compare against an f32 (HIGHEST-precision) lax conv on
    # bf16-rounded inputs + PixelUnshuffle(2); remaining diff is only f32
    # accumulation order (~1e-6).
    xb = x.astype(jnp.bfloat16).astype(jnp.float32)
    wb = w.astype(jnp.bfloat16).astype(jnp.float32)
    ref_conv = jax.lax.conv_general_dilated(
        xb, wb, window_strides=(1, 1), padding=((1, 1), (1, 1)),
        dimension_numbers=("NCHW", "OIHW", "NCHW"),
        precision=jax.lax.Precision.HIGHEST,
    )
    ref = ref_conv.reshape(B, C // 2, H // 2, 2, W // 2, 2)
    ref = jnp.transpose(ref, (0, 1, 3, 5, 2, 4)).reshape(B, 2 * C, H // 2, W // 2)

    assert out.shape == (B, 2 * C, H // 2, W // 2)
    assert out.dtype == x.dtype
    assert jnp.allclose(out, ref, atol=2e-3, rtol=2e-3), float(
        jnp.max(jnp.abs(out - ref)))
    print("KERNEL_OK")
</pallas_src>

<mosaic_0001>
module attributes {stable_mosaic.version = 11 : i64} {
  func.func @_down2x2_kernel(%arg0: i32, %arg1: i32, %arg2: memref<1x8x9x16xbf16, #tpu.memory_space<vmem>>, %arg3: memref<1x1x9x16xbf16, #tpu.memory_space<vmem>>, %arg4: memref<4x16x8xbf16, #tpu.memory_space<vmem>>, %arg5: memref<1x8x64xf32, #tpu.memory_space<vmem>>) attributes {dimension_semantics = [#tpu.dimension_semantics<parallel>, #tpu.dimension_semantics<parallel>], iteration_bounds = array<i64: 2, 1>, scalar_prefetch = 0 : i64, scratch_operands = 0 : i64, tpu.core_type = #tpu.core_type<tc>, window_params = [{transform_indices = @transform_0, window_bounds = array<i64: 1, 8, 9, 16>}, {transform_indices = @transform_1, window_bounds = array<i64: 1, 1, 9, 16>}, {pipeline_mode = #tpu.pipeline_mode<synchronous>, transform_indices = @transform_2, window_bounds = array<i64: 4, 16, 8>}, {transform_indices = @transform_3, window_bounds = array<i64: 1, 8, 64>}]} {
    %c0 = arith.constant 0 : index
    %c0_0 = arith.constant 0 : index
    %c0_1 = arith.constant 0 : index
    %c0_2 = arith.constant 0 : index
    %0 = vector.load %arg2[%c0, %c0_0, %c0_1, %c0_2] : memref<1x8x9x16xbf16, #tpu.memory_space<vmem>>, vector<1x8x9x16xbf16>
    %1 = vector.shape_cast %0 : vector<1x8x9x16xbf16> to vector<8x9x16xbf16>
    %c0_3 = arith.constant 0 : index
    %c0_4 = arith.constant 0 : index
    %c0_5 = arith.constant 0 : index
    %c0_6 = arith.constant 0 : index
    %2 = vector.load %arg3[%c0_3, %c0_4, %c0_5, %c0_6] : memref<1x1x9x16xbf16, #tpu.memory_space<vmem>>, vector<1x1x9x16xbf16>
    %3 = vector.shape_cast %2 : vector<1x1x9x16xbf16> to vector<1x9x16xbf16>
    %4 = tpu.concatenate %1, %3 in 0 : vector<8x9x16xbf16>, vector<1x9x16xbf16> -> vector<9x9x16xbf16>
    %5 = vector.extract_strided_slice %4 {offsets = [0, 0, 0], sizes = [8, 8, 16], strides = [1, 1, 1]} : vector<9x9x16xbf16> to vector<8x8x16xbf16>
    %6 = vector.shape_cast %5 : vector<8x8x16xbf16> to vector<64x16xbf16>
    %c0_7 = arith.constant 0 : index
    %c0_8 = arith.constant 0 : index
    %c0_9 = arith.constant 0 : index
    %7 = vector.load %arg4[%c0_7, %c0_8, %c0_9] : memref<4x16x8xbf16, #tpu.memory_space<vmem>>, vector<1x16x8xbf16>
    %8 = vector.shape_cast %7 : vector<1x16x8xbf16> to vector<16x8xbf16>
    %cst = arith.constant dense<0.000000e+00> : vector<64x8xf32>
    %9 = tpu.matmul %6, %8, %cst {dimension_numbers = #tpu.dot_dimension_numbers<[1], [0], [0], [1], [0, 0, 1, 1], [], []>} : vector<64x16xbf16>, vector<16x8xbf16>, vector<64x8xf32> -> vector<64x8xf32>
    %10 = vector.extract_strided_slice %4 {offsets = [0, 1, 0], sizes = [8, 8, 16], strides = [1, 1, 1]} : vector<9x9x16xbf16> to vector<8x8x16xbf16>
    %11 = vector.shape_cast %10 : vector<8x8x16xbf16> to vector<64x16xbf16>
    %c1 = arith.constant 1 : index
    %c0_10 = arith.constant 0 : index
    %c0_11 = arith.constant 0 : index
    %12 = vector.load %arg4[%c1, %c0_10, %c0_11] : memref<4x16x8xbf16, #tpu.memory_space<vmem>>, vector<1x16x8xbf16>
    %13 = vector.shape_cast %12 : vector<1x16x8xbf16> to vector<16x8xbf16>
    %cst_12 = arith.constant dense<0.000000e+00> : vector<64x8xf32>
    %14 = tpu.matmul %11, %13, %cst_12 {dimension_numbers = #tpu.dot_dimension_numbers<[1], [0], [0], [1], [0, 0, 1, 1], [], []>} : vector<64x16xbf16>, vector<16x8xbf16>, vector<64x8xf32> -> vector<64x8xf32>
    %15 = arith.addf %9, %14 : vector<64x8xf32>
    %16 = vector.extract_strided_slice %4 {offsets = [1, 0, 0], sizes = [8, 8, 16], strides = [1, 1, 1]} : vector<9x9x16xbf16> to vector<8x8x16xbf16>
    %17 = vector.shape_cast %16 : vector<8x8x16xbf16> to vector<64x16xbf16>
    %c2 = arith.constant 2 : index
    %c0_13 = arith.constant 0 : index
    %c0_14 = arith.constant 0 : index
    %18 = vector.load %arg4[%c2, %c0_13, %c0_14] : memref<4x16x8xbf16, #tpu.memory_space<vmem>>, vector<1x16x8xbf16>
    %19 = vector.shape_cast %18 : vector<1x16x8xbf16> to vector<16x8xbf16>
    %cst_15 = arith.constant dense<0.000000e+00> : vector<64x8xf32>
    %20 = tpu.matmul %17, %19, %cst_15 {dimension_numbers = #tpu.dot_dimension_numbers<[1], [0], [0], [1], [0, 0, 1, 1], [], []>} : vector<64x16xbf16>, vector<16x8xbf16>, vector<64x8xf32> -> vector<64x8xf32>
    %21 = arith.addf %15, %20 : vector<64x8xf32>
    %22 = vector.extract_strided_slice %4 {offsets = [1, 1, 0], sizes = [8, 8, 16], strides = [1, 1, 1]} : vector<9x9x16xbf16> to vector<8x8x16xbf16>
    %23 = vector.shape_cast %22 : vector<8x8x16xbf16> to vector<64x16xbf16>
    %c3 = arith.constant 3 : index
    %c0_16 = arith.constant 0 : index
    %c0_17 = arith.constant 0 : index
    %24 = vector.load %arg4[%c3, %c0_16, %c0_17] : memref<4x16x8xbf16, #tpu.memory_space<vmem>>, vector<1x16x8xbf16>
    %25 = vector.shape_cast %24 : vector<1x16x8xbf16> to vector<16x8xbf16>
    %cst_18 = arith.constant dense<0.000000e+00> : vector<64x8xf32>
    %26 = tpu.matmul %23, %25, %cst_18 {dimension_numbers = #tpu.dot_dimension_numbers<[1], [0], [0], [1], [0, 0, 1, 1], [], []>} : vector<64x16xbf16>, vector<16x8xbf16>, vector<64x8xf32> -> vector<64x8xf32>
    %27 = arith.addf %21, %26 : vector<64x8xf32>
    %28 = tpu.transpose %27, [1, 0] : vector<64x8xf32> -> vector<8x64xf32>
    %29 = vector.shape_cast %28 : vector<8x64xf32> to vector<1x8x64xf32>
    %c0_19 = arith.constant 0 : index
    %c0_20 = arith.constant 0 : index
    %c0_21 = arith.constant 0 : index
    %30 = vector.load %arg5[%c0_19, %c0_20, %c0_21] : memref<1x8x64xf32, #tpu.memory_space<vmem>>, vector<1x8x64xf32>
    tpu.vector_store %arg5[%c0_19, %c0_20, %c0_21], %29 {strides = array<i32>} : memref<1x8x64xf32, #tpu.memory_space<vmem>>, vector<1x8x64xf32>,
    return
  }
  func.func @transform_0(%arg0: i32, %arg1: i32) -> (i32, i32, i32, i32) {
    %c0_i32 = arith.constant 0 : i32
    %c0_i32_0 = arith.constant 0 : i32
    %c0_i32_1 = arith.constant 0 : i32
    return %arg0, %arg1, %c0_i32, %c0_i32_0 : i32, i32, i32, i32
  }
  func.func @transform_1(%arg0: i32, %arg1: i32) -> (i32, i32, i32, i32) {
    %c1_i32 = arith.constant 1 : i32
    %0 = arith.addi %arg1, %c1_i32 : i32
    %c8_i32 = arith.constant 8 : i32
    %1 = arith.muli %0, %c8_i32 : i32
    %c0_i32 = arith.constant 0 : i32
    %c0_i32_0 = arith.constant 0 : i32
    %c0_i32_1 = arith.constant 0 : i32
    return %arg0, %1, %c0_i32, %c0_i32_0 : i32, i32, i32, i32
  }
  func.func @transform_2(%arg0: i32, %arg1: i32) -> (i32, i32, i32) {
    %c0_i32 = arith.constant 0 : i32
    %c0_i32_0 = arith.constant 0 : i32
    %c0_i32_1 = arith.constant 0 : i32
    %c0_i32_2 = arith.constant 0 : i32
    return %c0_i32, %c0_i32_0, %c0_i32_1 : i32, i32, i32
  }
  func.func @transform_3(%arg0: i32, %arg1: i32) -> (i32, i32, i32) {
    %c0_i32 = arith.constant 0 : i32
    %c0_i32_0 = arith.constant 0 : i32
    return %arg0, %c0_i32, %arg1 : i32, i32, i32
  }
}

</mosaic_0001>

<bundles_post_ra>
// kernel: downsample_forward.1
= control target key start
LH: loop header
LB: loop body
LE: loop exit
PB: predicated region body
PF: predicated region fallthrough
CT: control target
= control target key end

     0   :  { %s1164_s12 = smov 0   ;;  %s1166_s13 = smov 0   ;;  %s1322_s0 = inlined_call_operand.vmem [shape: bf16[2,9,9,16], index: 0, kind: input, shape index: {}, may-alias: {0,1}]   ;;  %s1323_s1 = inlined_call_operand.vmem [shape: bf16[2,9,9,16], index: 1, kind: input, shape index: {}, may-alias: {0,1}]   ;;  %s1324_s2 = inlined_call_operand.vmem [shape: bf16[4,16,8], index: 2, kind: input, shape index: {}]   ;;  %s1325_s3 = inlined_call_operand.vmem [shape: f32[2,8,64], index: 3, kind: output, shape index: {}]  }
   0x1   :  { %s1168_s14 = smov 0  }
   0x2 LB: > { %s25_s15 = sadd.s32 1, %s1138_s13  ;;  %p971_p0 = scmp.ge.s32.totalorder %s1142_s14, 1  ;;  %s1142_s14 = sphi %s1168_s14, %s13_s14   ;;  %s1138_s13 = sphi %s1166_s13, %s1329_s13   ;;  %s1134_s12 = sphi %s1164_s12, %s1328_s12  }
   0x3   : > { %p27_p1 = scmp.ge.s32.totalorder %s25_s15, 2  ;;  %p193_p2 = scmp.lt.s32.totalorder %s1142_s14, 3 }
   0x5   : > { %s1331_s15 = smov (%p27_p1, %s25_s15), 0  ;;  %p194_p3 = pnand %p971_p0, %p193_p2 }
   0x6   : > { %p246_p4 = scmp.lt.s32.totalorder (!%p194_p3), %s1134_s12, 1 }
   0x7   : > { %197 = sbr.rel (%p194_p3) target bundleno = 376 (0x178), region = 32 }
   0xc   : > { %v1109_v0 = vld [vmem:[%s1324_s2] sm:$0xff]   ;;  %v1110_v1 = vld [vmem:[%s1324_s2 + $0x8] sm:$0xff]   ;;  %s1333_s12 = smov (!%p246_p4, %s1134_s12), 1  ;;  %v1193_v2 = vld [vmem:[%s1324_s2 + $0x10] sm:$0xff]   ;;  %vm438_vm0 = vcmask 130048   ;;  %vm864_vm4 = vcmask 523264  }
   0xd   : > { %1051 = vmatprep.subr.bf16.mxu1 %v1109_v0  ;;  %1041 = vmatprep.subr.bf16.mxu0 %v1110_v1  ;;  %s1081_s22 = smul.u32 72, %s1333_s12  ;;  %v1114_v3 = vld [vmem:[%s1324_s2 + $0x18] sm:$0xff]   ;;  %vm302_vm1 = vsmask.f32 3328  ;;  %vm303_vm2 = vsmask.f32 7440 }
   0xe   : > { %1052 = vmatpush3.bf16.msra.mxu1 %v1109_v0  ;;  %1042 = vmatpush3.bf16.msra.mxu0 %v1110_v1  ;;  %vm1233_vm3 = vmor %vm302_vm1, %vm303_vm2  ;;  %s974_s5 = sshll.u32 %s1333_s12, 3 }
   0xf   : > { %1061 = vmatprep.subr.bf16.mxu0 %v1193_v2  ;;  %s1205_s27 = scalar_lea.vmem %s1322_s0, %s1081_s22  ;;  %1071 = vmatprep.subr.bf16.mxu1 %v1114_v3  ;;  %s1020_s28 = sadd.s32 64, %s1081_s22 }
  0x10   : > { %v282_v4 = vld [vmem:[%s1205_s27] sm:$0xf]  ;;  %v1209_v5 = vld [vmem:[%s1205_s27 + $0x8] sm:$0xf]  ;;  %v1212_v6 = vld [vmem:[%s1205_s27 + $0x10] sm:$0xf]  ;;  %s271_s4 = scalar_lea.vmem %s1323_s1, %s1020_s28  ;;  %s280_s8 = scalar_lea.vmem %s1325_s3, %s974_s5 }
  0x11   : > { %v306_v7 = vshrl.u32 %v282_v4, 16  ;;  %v309_v8 = vshll.u32 %v282_v4, 16  ;;  %v320_v9 = vshrl.u32 %v1209_v5, 16  ;;  %v323_v10 = vshll.u32 %v1209_v5, 16  ;;  %v1217_v11 = vld [vmem:[%s1205_s27 + $0x18] sm:$0xf] }
  0x12   : > { %v986_v12 = vcombine.low %v282_v4, %v1209_v5  ;;  %v987_v13 = vcombine.low %v1212_v6, %v1217_v11  ;;  %v283_v14 = vld [vmem:[%s1205_s27 + $0x4] sm:$0x1]  ;;  %v285_v15 = vld [vmem:[%s1205_s27 + $0xc] sm:$0x1]  ;;  %v287_v16 = vld [vmem:[%s1205_s27 + $0x14] sm:$0x1] }
  0x13   : > { %v308_v17 = vrot.slane %v306_v7, 4  ;;  %v311_v18 = vrot.slane %v309_v8, 5  ;;  %v315_v19 = vshll.u32 %v283_v14, 16  ;;  %v322_v20 = vrot.slane %v320_v9, 4  ;;  %v289_v23 = vld [vmem:[%s1205_s27 + $0x1c] sm:$0x1] }
  0x14   : > { %1053 = vmatprep.mubr.msk.bf16.mxu1 %vm438_vm0, %v986_v12  ;;  %v325_v21 = vrot.slane %v323_v10, 5  ;;  %v329_v22 = vshll.u32 %v285_v15, 16  ;;  %v334_v25 = vshrl.u32 %v1212_v6, 16  ;;  %v337_v26 = vshll.u32 %v1212_v6, 16  ;;  %v1231_v28 = vld [vmem:[%s1205_s27 + $0x20] sm:$0xf] }
  0x15   : > { %1054 = vmatmul.mubr.msk.bf16.vlgmr.msra.gmra.mxu1 %vm438_vm0, %v987_v13  ;;  %v312_v24 = vor.u32 %v311_v18, %v308_v17  ;;  %v343_v27 = vshll.u32 %v287_v16, 16  ;;  %v317_v30 = vrot.slane %v315_v19, 5  ;;  %v348_v33 = vshrl.u32 %v1217_v11, 16  ;;  %v291_v34 = vld [vmem:[%s1205_s27 + $0x24] sm:$0x1] }
  0x16   : > { %v326_v31 = vor.u32 %v325_v21, %v322_v20  ;;  %v331_v32 = vrot.slane %v329_v22, 5  ;;  %1072 = vmatpush3.bf16.msra.mxu1 %v1114_v3  ;;  %v336_v36 = vrot.slane %v334_v25, 4  ;;  %v339_v37 = vrot.slane %v337_v26, 5  ;;  %v1245_v47 = vld [vmem:[%s1205_s27 + $0x28] sm:$0xf] }
  0x17   : > { %v313_v35 = vrot.slane %v312_v24, 4  ;;  %v345_v38 = vrot.slane %v343_v27, 5  ;;  %v350_v40 = vrot.slane %v348_v33, 4  ;;  %v351_v41 = vshll.u32 %v1217_v11, 16  ;;  %v1250_v52 = vld [vmem:[%s1205_s27 + $0x30] sm:$0xf] }
  0x18   : > { %v327_v39 = vrot.slane %v326_v31, 4  ;;  %v357_v42 = vshll.u32 %v289_v23, 16  ;;  %v340_v44 = vor.u32 %v339_v37, %v336_v36  ;;  %v362_v45 = vshrl.u32 %v1231_v28, 16  ;;  %v1253_v57 = vld [vmem:[%s1205_s27 + $0x38] sm:$0xf] }
  0x19   : > { %v318_v43 = vsel %vm1233_vm3, %v313_v35, %v317_v30  ;;  %v365_v46 = vshll.u32 %v1231_v28, 16  ;;  %v353_v49 = vrot.slane %v351_v41, 5  ;;  %v371_v51 = vshll.u32 %v291_v34, 16  ;;  %v293_v3 = vld [vmem:[%s1205_s27 + $0x2c] sm:$0x1] }
  0x1a   : > { %v332_v48 = vsel %vm1233_vm3, %v327_v39, %v331_v32  ;;  %v359_v50 = vrot.slane %v357_v42, 5  ;;  %v341_v53 = vrot.slane %v340_v44, 4  ;;  %v364_v54 = vrot.slane %v362_v45, 4  ;;  %v295_v10 = vld [vmem:[%s1205_s27 + $0x34] sm:$0x1] }
  0x1b   : > { %v367_v55 = vrot.slane %v365_v46, 5  ;;  %v977_v56 = vcombine.low %v318_v43, %v332_v48  ;;  %v354_v58 = vor.u32 %v353_v49, %v350_v40  ;;  %v373_v59 = vrot.slane %v371_v51, 5  ;;  %v297_v19 = vld [vmem:[%s1205_s27 + $0x3c] sm:$0x1]  ;;  %v298_v30 = vld [vmem:[%s271_s4] sm:$0xf] }
  0x1c   : > { %v376_v60 = vshrl.u32 %v1245_v47, 16  ;;  %v379_v61 = vshll.u32 %v1245_v47, 16  ;;  %v346_v62 = vsel %vm1233_vm3, %v341_v53, %v345_v38  ;;  %v988_v0 = vcombine.low %v1231_v28, %v1245_v47  ;;  %v299_v35 = vld [vmem:[%s271_s4 + $0x4] sm:$0x1] }
  0x1d   : > { %v368_v63 = vor.u32 %v367_v55, %v364_v54  ;;  %1043 = vmatprep.mubr.msk.bf16.mxu0 %vm438_vm0, %v977_v56  ;;  %v390_v1 = vshrl.u32 %v1250_v52, 16  ;;  %v355_v4 = vrot.slane %v354_v58, 4  ;;  %v1008_v7 = vcombine.low %v332_v48, %v346_v62 }
  0x1e   : > { %v393_v8 = vshll.u32 %v1250_v52, 16  ;;  %v404_v9 = vshrl.u32 %v1253_v57, 16  ;;  %1057 = vmatprep.mubr.msk.bf16.mxu1 %vm438_vm0, %v988_v0  ;;  %v407_v13 = vshll.u32 %v1253_v57, 16  ;;  %v989_v14 = vcombine.low %v1250_v52, %v1253_v57 }
  0x1f   : > { %v369_v12 = vrot.slane %v368_v63, 4  ;;  %v378_v15 = vrot.slane %v376_v60, 4  ;;  %v360_v16 = vsel %vm1233_vm3, %v355_v4, %v359_v50  ;;  %v381_v17 = vrot.slane %v379_v61, 5 }
  0x20   : > { %v385_v18 = vshll.u32 %v293_v3, 16  ;;  %v392_v20 = vrot.slane %v390_v1, 4  ;;  %v978_v21 = vcombine.low %v346_v62, %v360_v16  ;;  %1058 = vmatmul.mubr.msk.bf16.gmra.mxu1 %vm438_vm0, %v989_v14  ;;  %v395_v22 = vrot.slane %v393_v8, 5 }
  0x21   : > { %v399_v23 = vshll.u32 %v295_v10, 16  ;;  %v374_v24 = vsel %vm1233_vm3, %v369_v12, %v373_v59  ;;  %v382_v25 = vor.u32 %v381_v17, %v378_v15  ;;  %v406_v27 = vrot.slane %v404_v9, 4  ;;  %1073 = vmatprep.mubr.msk.bf16.mxu1 %vm438_vm0, %v1008_v7 }
  0x22   : > { %v387_v26 = vrot.slane %v385_v18, 5  ;;  %1044 = vmatmul.mubr.msk.bf16.vlgmr.msra.gmra.mxu0 %vm438_vm0, %v978_v21  ;;  %v396_v31 = vor.u32 %v395_v22, %v392_v20  ;;  %v409_v33 = vrot.slane %v407_v13, 5  ;;  %v413_v34 = vshll.u32 %v297_v19, 16 }
  0x23   : > { %v401_v32 = vrot.slane %v399_v23, 5  ;;  %v1009_v36 = vcombine.low %v360_v16, %v374_v24  ;;  %1062 = vmatpush3.bf16.msra.mxu0 %v1193_v2  ;;  %v383_v37 = vrot.slane %v382_v25, 4  ;;  %v720_v41 = vshrl.u32 %v298_v30, 16 }
  0x24   : > { %v397_v38 = vrot.slane %v396_v31, 4  ;;  %v410_v39 = vor.u32 %v409_v33, %v406_v27  ;;  %v415_v40 = vrot.slane %v413_v34, 5  ;;  %v723_v43 = vshll.u32 %v298_v30, 16 }
  0x25   : > { %v388_v42 = vsel %vm1233_vm3, %v383_v37, %v387_v26  ;;  %v729_v44 = vshll.u32 %v299_v35, 16  ;;  %v722_v49 = vrot.slane %v720_v41, 4  ;;  %v997_v53 = vcombine.low %v1209_v5, %v1212_v6 }
  0x26   : > { %v979_v45 = vcombine.low %v374_v24, %v388_v42  ;;  %v402_v46 = vsel %vm1233_vm3, %v397_v38, %v401_v32  ;;  %v411_v48 = vrot.slane %v410_v39, 4  ;;  %v725_v50 = vrot.slane %v723_v43, 5 }
  0x27   : > { %v1010_v51 = vcombine.low %v388_v42, %v402_v46  ;;  %v731_v55 = vrot.slane %v729_v44, 5  ;;  %v998_v61 = vcombine.low %v1217_v11, %v1231_v28  ;;  %v999_v5 = vcombine.low %v1245_v47, %v1250_v52 }
  0x28   : > { %1047 = vmatprep.mubr.msk.bf16.mxu0 %vm438_vm0, %v979_v45  ;;  %v416_v2 = vsel %vm1233_vm3, %v411_v48, %v415_v40  ;;  %1074 = vmatmul.mubr.msk.bf16.vlgmr.msra.gmra.mxu1 %vm438_vm0, %v1009_v36  ;;  %v726_v56 = vor.u32 %v725_v50, %v722_v49  ;;  %v1000_v6 = vcombine.low %v1253_v57, %v298_v30 }
  0x29   : > { %v980_v54 = vcombine.low %v402_v46, %v416_v2  ;;  %1077 = vmatprep.mubr.msk.bf16.mxu1 %vm438_vm0, %v1010_v51 }
  0x2a   : > { %v727_v58 = vrot.slane %v726_v56, 4 }
  0x2b   : > { %1048 = vmatmul.mubr.msk.bf16.gmra.mxu0 %vm438_vm0, %v980_v54 }
  0x2c   : > { %1063 = vmatprep.mubr.msk.bf16.mxu0 %vm438_vm0, %v997_v53  ;;  %v732_v59 = vsel %vm1233_vm3, %v727_v58, %v731_v55 }
  0x2d   : > { %v1011_v60 = vcombine.low %v416_v2, %v732_v59 }
  0x30   : > { %1078 = vmatmul.mubr.msk.bf16.gmra.mxu1 %vm438_vm0, %v1011_v60 }
  0x33   : > { %1064 = vmatmul.mubr.msk.bf16.vlgmr.msra.gmra.mxu0 %vm438_vm0, %v998_v61 }
  0x34   : > { %1067 = vmatprep.mubr.msk.bf16.mxu0 %vm438_vm0, %v999_v5 }
  0x3b   : > { %1068 = vmatmul.mubr.msk.bf16.gmra.mxu0 %vm438_vm0, %v1000_v6 }
  0xd5   : > { %v1055_v62 = vpop.f32.mrf.mxu1 }
  0xd7   : > { %v588_v29 = vpop.f32.mrf.mxu1 }
  0xd9   : > { %v1056_v63 = vpop.f32.mrf.mxu1 }
  0xdb   : > { %v591_v0 = vpop.f32.mrf.mxu1 }
  0xe0   : > { %v1059_v1 = vpop.f32.mrf.mxu1 }
  0xe2   : > { %v1045_v3 = vpop.f32.mrf.mxu0  ;;  %v604_v11 = vpop.f32.mrf.mxu1 }
  0xe3   : > { %v597_v23 = vadd.f32 %v1055_v62, %v1045_v3 }
  0xe4   : > { %v485_v28 = vpop.f32.mrf.mxu0  ;;  %v1060_v47 = vpop.f32.mrf.mxu1 }
  0xe5   : > { %v589_v15 = vadd.f32 %v588_v29, %v485_v28 }
  0xe6   : > { %v1046_v4 = vpop.f32.mrf.mxu0  ;;  %v607_v8 = vpop.f32.mrf.mxu1 }
  0xe7   : > { %v600_v33 = vadd.f32 %v1056_v63, %v1046_v4 }
  0xe8   : > { %v488_v52 = vpop.f32.mrf.mxu0  ;;  %v1075_v12 = vpop.f32.mrf.mxu1 }
  0xe9   : > { %v592_v20 = vadd.f32 %v591_v0, %v488_v52 }
  0xea   : > { %v793_v57 = vpop.f32.mrf.mxu1 }
  0xeb   : > { %v1049_v7 = vpop.f32.mrf.mxu0 }
  0xec   : > { %v1076_v18 = vpop.f32.mrf.mxu1  ;;  %v613_v48 = vadd.f32 %v1059_v1, %v1049_v7 }
  0xed   : > { %v501_v9 = vpop.f32.mrf.mxu0 }
  0xee   : > { %v796_v25 = vpop.f32.mrf.mxu1  ;;  %v605_v38 = vadd.f32 %v604_v11, %v501_v9 }
  0xef   : > { %v1050_v10 = vpop.f32.mrf.mxu0 }
  0xf0   : > { %v1079_v32 = vpop.f32.mrf.mxu1  ;;  %v616_v51 = vadd.f32 %v1060_v47, %v1050_v10 }
  0xf1   : > { %v504_v13 = vpop.f32.mrf.mxu0 }
  0xf2   : > { %v809_v37 = vpop.f32.mrf.mxu1  ;;  %v608_v43 = vadd.f32 %v607_v8, %v504_v13 }
  0xf3   : > { %v1065_v14 = vpop.f32.mrf.mxu0 }
  0xf4   : > { %v713_v27 = vadd.f32 %v1065_v14, %v597_v23  ;;  %v1080_v42 = vpop.f32.mrf.mxu1 }
  0xf5   : > { %v680_v16 = vpop.f32.mrf.mxu0 }
  0xf6   : > { %v711_v17 = vadd.f32 %v680_v16, %v589_v15  ;;  %v826_v35 = vadd.f32 %v1075_v12, %v713_v27  ;;  %v812_v46 = vpop.f32.mrf.mxu1 }
  0xf7   : > { %v1066_v19 = vpop.f32.mrf.mxu0 }
  0xf8   : > { %v824_v21 = vadd.f32 %v793_v57, %v711_v17  ;;  %v714_v34 = vadd.f32 %v1066_v19, %v600_v33 }
  0xf9   : > { %v683_v22 = vpop.f32.mrf.mxu0 }
  0xfa   : > { %v712_v24 = vadd.f32 %v683_v22, %v592_v20  ;;  %832 = vxpose.xlu0.b32.start [1/8] (short) (narrow) %v824_v21, 8  ;;  %v827_v40 = vadd.f32 %v1076_v18, %v714_v34 }
  0xfb   : > { %v1069_v26 = vpop.f32.mrf.mxu0 }
  0xfc   : > { %v825_v30 = vadd.f32 %v796_v25, %v712_v24  ;;  %v717_v49 = vadd.f32 %v1069_v26, %v613_v48 }
  0xfd   : > { %v696_v31 = vpop.f32.mrf.mxu0 }
  0xfe   : > { %833 = vxpose.xlu0.b32.cont [2/8] (short) (narrow) %v825_v30, 8  ;;  %v715_v39 = vadd.f32 %v696_v31, %v605_v38  ;;  %v830_v2 = vadd.f32 %v1079_v32, %v717_v49 }
  0xff   : > { %v1070_v36 = vpop.f32.mrf.mxu0 }
 0x100   : > { %v828_v44 = vadd.f32 %v809_v37, %v715_v39  ;;  %v718_v53 = vadd.f32 %v1070_v36, %v616_v51 }
 0x101   : > { %v699_v41 = vpop.f32.mrf.mxu0 }
 0x102   : > { %834 = vxpose.xlu0.b32.cont [3/8] (short) (narrow) %v826_v35, 8  ;;  %v716_v45 = vadd.f32 %v699_v41, %v608_v43  ;;  %v831_v54 = vadd.f32 %v1080_v42, %v718_v53 }
 0x104   : > { %v829_v50 = vadd.f32 %v812_v46, %v716_v45 }
 0x106   : > { %835 = vxpose.xlu0.b32.cont [4/8] (short) (narrow) %v827_v40, 8 }
 0x10a   : > { %836 = vxpose.xlu0.b32.cont [5/8] (short) (narrow) %v828_v44, 8 }
 0x10e   : > { %837 = vxpose.xlu0.b32.cont [6/8] (short) (narrow) %v829_v50, 8 }
 0x112   : > { %838 = vxpose.xlu0.b32.cont [7/8] (short) (narrow) %v830_v2, 8 }
 0x116   : > { %839 = vxpose.xlu0.b32.end [8/8] (short) (narrow) %v831_v54, 8 }
 0x176   : > { %v848_v55 = vpop.trf.xlu0 }
 0x177   : > { %865 = vst.msk [vmem:[%s280_s8] sm:$0xff] %vm864_vm4, %v848_v55 }
 0x178 PF: > { %s13_s14 = sadd.s32 1, %s1142_s14   ;;  %s1328_s12 = smov %s1138_s13 }
 0x179   : > { %p10_p5 = scmp.ge.s32.totalorder %s13_s14, 4   ;;  %s1329_s13 = smov %s1331_s15 }
 0x17b   :  { %12 = sbr.rel (!%p10_p5) target bundleno = 2 (0x2), region = 68 }

</bundles_post_ra>
